<compile_context>
chip_gen: v5e
topology: v5e:2x2
jax: 0.10.0
libtpu: 0.0.40
codegen_flags: <defaults>
</compile_context>

<pallas_src>
import math

import jax
import jax.numpy as jnp
from jax import lax
from jax.experimental import pallas as pl
from jax.experimental.pallas import tpu as pltpu


def _vmem_capacity_bytes():
    try:
        return int(pltpu.get_tpu_info().vmem_capacity_bytes)
    except Exception:
        return 64 << 20  # conservative (v7x-sized) fallback


def se_block(x_nchw, w1, b1, w2, b2, *, donate_x=False):
    """Squeeze-and-Excitation forward.

    x_nchw: (B, C, H, W)
    w1: (Cr, C)  fc1.weight in PyTorch (out, in) layout,  b1: (Cr,)
    w2: (C, Cr)  fc2.weight,                              b2: (C,)
    """
    B, C, H, W = x_nchw.shape
    Cr = w1.shape[0]
    HW = H * W
    dtype = x_nchw.dtype
    itemsize = jnp.dtype(dtype).itemsize

    # --- lane-dense spatial axis: pad HW up to a multiple of 128 -------------
    HWp = ((HW + 127) // 128) * 128
    x = x_nchw.reshape(B, C, HW)
    if HWp != HW:
        x = jnp.pad(x, ((0, 0), (0, 0), (0, HWp - HW)))

    # --- weights in (in, out) form so the excitation is a batched matmul -----
    w1t = jnp.transpose(w1)          # (C, Cr)
    w2t = jnp.transpose(w2)          # (Cr, C)
    b1r = b1.reshape(1, Cr)
    b2r = b2.reshape(1, C)
    w_bytes = (w1t.size + w2t.size + b1r.size + b2r.size) * jnp.dtype(w1.dtype).itemsize

    # --- block sizing: ~1-4 MB blocks, double-buffered in/out + weights ------
    vmem_cap = _vmem_capacity_bytes()
    budget = int(vmem_cap * 3 // 4)                 # headroom for compiler scratch
    per_batch = C * HWp * itemsize                  # bytes of one batch element's slab
    b_blk = max(1, min(B, (4 << 20) // per_batch))  # target ~4 MB per block
    fit = max(1, (budget - w_bytes - (2 << 20)) // (4 * per_batch))  # 2x in + 2x out
    b_blk = max(1, min(b_blk, fit))
    while B % b_blk:                                # keep the grid exact
        b_blk -= 1
    grid_b = B // b_blk
    # (On v7x, a grid length that is a multiple of 2 keeps both TensorCores
    #  busy; at overhead-bound demo shapes a single step is preferred.)

    blk_bytes = b_blk * per_batch
    vmem_limit = int(min(max(4 * blk_bytes + w_bytes + (2 << 20), 16 << 20), budget))

    inv_hw = 1.0 / float(HW)                        # true (unpadded) spatial size
    sqrt_half = 1.0 / math.sqrt(2.0)

    def _se_kernel(x_ref, w1t_ref, b1_ref, w2t_ref, b2_ref, o_ref):
        # x_ref / o_ref: (b_blk, C, HWp) slab; weights resident across steps.
        x_blk = x_ref[...]                                           # native dtype

        # squeeze: global average pool over spatial lanes, f32 accumulation.
        y = jnp.sum(x_blk, axis=2, dtype=jnp.float32) * inv_hw       # (b_blk, C)

        # excitation: Linear -> GELU(exact erf) -> Linear -> Sigmoid.
        wdt = w1t_ref.dtype
        h = jnp.dot(y.astype(wdt), w1t_ref[...],
                    preferred_element_type=jnp.float32)
        h = h + b1_ref[...].astype(jnp.float32)                      # (b_blk, Cr)
        h = 0.5 * h * (1.0 + lax.erf(h * sqrt_half))
        s = jnp.dot(h.astype(wdt), w2t_ref[...],
                    preferred_element_type=jnp.float32)
        s = jax.nn.sigmoid(s + b2_ref[...].astype(jnp.float32))      # (b_blk, C)

        # scale: per-channel gate broadcast over the spatial lane axis.
        o_ref[...] = x_blk * s[:, :, None].astype(x_blk.dtype)

    cost = pl.CostEstimate(
        flops=2 * B * C * HW + 4 * B * C * Cr,
        transcendentals=B * (C + Cr),
        bytes_accessed=2 * B * C * HW * itemsize + w_bytes,
    )

    out = pl.pallas_call(
        _se_kernel,
        out_shape=jax.ShapeDtypeStruct((B, C, HWp), dtype),
        grid_spec=pltpu.PrefetchScalarGridSpec(
            num_scalar_prefetch=0,
            grid=(grid_b,),
            in_specs=[
                pl.BlockSpec((b_blk, C, HWp), lambda i: (i, 0, 0)),  # x slab
                pl.BlockSpec((C, Cr), lambda i: (0, 0)),             # w1^T
                pl.BlockSpec((1, Cr), lambda i: (0, 0)),             # b1
                pl.BlockSpec((Cr, C), lambda i: (0, 0)),             # w2^T
                pl.BlockSpec((1, C), lambda i: (0, 0)),              # b2
            ],
            out_specs=pl.BlockSpec((b_blk, C, HWp), lambda i: (i, 0, 0)),
        ),
        compiler_params=pltpu.CompilerParams(
            dimension_semantics=("parallel",),
            vmem_limit_bytes=vmem_limit,
        ),
        cost_estimate=cost,
        input_output_aliases=({0: 0} if donate_x else {}),
    )(x, w1t, b1r, w2t, b2r)

    if HWp != HW:
        out = out[:, :, :HW]
    return out.reshape(B, C, H, W)


def _reference(x, w1, b1, w2, b2):
    # Pure-JAX reference of the PyTorch forward (weights in (out, in) layout).
    y = jnp.mean(x, axis=(2, 3))                                # (B, C)
    h = y @ w1.T + b1
    h = 0.5 * h * (1.0 + lax.erf(h / jnp.sqrt(2.0)))            # exact GELU
    s = jax.nn.sigmoid(h @ w2.T + b2)                           # (B, C)
    return x * s[:, :, None, None]


if __name__ == "__main__":
    B, C, H, W = 2, 64, 16, 16      # HW = 256 -> already lane-dense
    reduction = 16
    Cr = C // reduction

    key = jax.random.PRNGKey(0)
    kx, k1, k2, k3, k4 = jax.random.split(key, 5)

    x = jax.random.normal(kx, (B, C, H, W), dtype=jnp.float32)

    # Deterministic parameter init, PyTorch (out, in) weight layout.
    bound1 = 1.0 / math.sqrt(C)
    w1 = jax.random.uniform(k1, (Cr, C), jnp.float32, -bound1, bound1)
    b1 = jax.random.uniform(k2, (Cr,), jnp.float32, -bound1, bound1)
    bound2 = 1.0 / math.sqrt(Cr)
    w2 = jax.random.uniform(k3, (C, Cr), jnp.float32, -bound2, bound2)
    b2 = jax.random.uniform(k4, (C,), jnp.float32, -bound2, bound2)

    out = se_block(x, w1, b1, w2, b2)
    out = jax.block_until_ready(out)

    ref = _reference(x, w1, b1, w2, b2)
    assert out.shape == (B, C, H, W)
    assert jnp.allclose(out, ref, atol=1e-5, rtol=1e-5), "mismatch vs reference"

    print("KERNEL_OK")
</pallas_src>

<mosaic_0001>
module attributes {stable_mosaic.version = 11 : i64} {
  func.func @_se_kernel(%arg0: i32, %arg1: memref<2x64x256xf32, #tpu.memory_space<vmem>>, %arg2: memref<64x4xf32, #tpu.memory_space<vmem>>, %arg3: memref<1x4xf32, #tpu.memory_space<vmem>>, %arg4: memref<4x64xf32, #tpu.memory_space<vmem>>, %arg5: memref<1x64xf32, #tpu.memory_space<vmem>>, %arg6: memref<2x64x256xf32, #tpu.memory_space<vmem>>) attributes {dimension_semantics = [#tpu.dimension_semantics<parallel>], iteration_bounds = array<i64: 1>, scalar_prefetch = 0 : i64, scratch_operands = 0 : i64, tpu.core_type = #tpu.core_type<tc>, window_params = [{transform_indices = @transform_0, window_bounds = array<i64: 2, 64, 256>}, {pipeline_mode = #tpu.pipeline_mode<synchronous>, transform_indices = @transform_1, window_bounds = array<i64: 64, 4>}, {pipeline_mode = #tpu.pipeline_mode<synchronous>, transform_indices = @transform_2, window_bounds = array<i64: 1, 4>}, {pipeline_mode = #tpu.pipeline_mode<synchronous>, transform_indices = @transform_3, window_bounds = array<i64: 4, 64>}, {pipeline_mode = #tpu.pipeline_mode<synchronous>, transform_indices = @transform_4, window_bounds = array<i64: 1, 64>}, {transform_indices = @transform_5, window_bounds = array<i64: 2, 64, 256>}]} {
    %c0 = arith.constant 0 : index
    %c0_0 = arith.constant 0 : index
    %c0_1 = arith.constant 0 : index
    %0 = vector.load %arg1[%c0, %c0_0, %c0_1] : memref<2x64x256xf32, #tpu.memory_space<vmem>>, vector<2x64x256xf32>
    %cst = arith.constant dense<0.000000e+00> : vector<2x64xf32>
    %1 = vector.multi_reduction <add>, %0, %cst [2] : vector<2x64x256xf32> to vector<2x64xf32>
    %cst_2 = arith.constant 3.906250e-03 : f32
    %2 = vector.broadcast %cst_2 : f32 to vector<2x64xf32>
    %3 = arith.mulf %1, %2 : vector<2x64xf32>
    %c0_3 = arith.constant 0 : index
    %c0_4 = arith.constant 0 : index
    %4 = vector.load %arg2[%c0_3, %c0_4] : memref<64x4xf32, #tpu.memory_space<vmem>>, vector<64x4xf32>
    %cst_5 = arith.constant dense<0.000000e+00> : vector<2x4xf32>
    %5 = tpu.matmul %3, %4, %cst_5 {dimension_numbers = #tpu.dot_dimension_numbers<[1], [0], [0], [1], [0, 0, 1, 1], [], []>} : vector<2x64xf32>, vector<64x4xf32>, vector<2x4xf32> -> vector<2x4xf32>
    %c0_6 = arith.constant 0 : index
    %c0_7 = arith.constant 0 : index
    %6 = vector.load %arg3[%c0_6, %c0_7] : memref<1x4xf32, #tpu.memory_space<vmem>>, vector<1x4xf32>
    %7 = vector.broadcast %6 : vector<1x4xf32> to vector<2x4xf32>
    %8 = arith.addf %5, %7 : vector<2x4xf32>
    %cst_8 = arith.constant 5.000000e-01 : f32
    %9 = vector.broadcast %cst_8 : f32 to vector<2x4xf32>
    %10 = arith.mulf %9, %8 : vector<2x4xf32>
    %cst_9 = arith.constant 0.707106769 : f32
    %11 = vector.broadcast %cst_9 : f32 to vector<2x4xf32>
    %12 = arith.mulf %8, %11 : vector<2x4xf32>
    %13 = math.erf %12 : vector<2x4xf32>
    %cst_10 = arith.constant 1.000000e+00 : f32
    %14 = vector.broadcast %cst_10 : f32 to vector<2x4xf32>
    %15 = arith.addf %14, %13 : vector<2x4xf32>
    %16 = arith.mulf %10, %15 : vector<2x4xf32>
    %c0_11 = arith.constant 0 : index
    %c0_12 = arith.constant 0 : index
    %17 = vector.load %arg4[%c0_11, %c0_12] : memref<4x64xf32, #tpu.memory_space<vmem>>, vector<4x64xf32>
    %cst_13 = arith.constant dense<0.000000e+00> : vector<2x64xf32>
    %18 = tpu.matmul %16, %17, %cst_13 {dimension_numbers = #tpu.dot_dimension_numbers<[1], [0], [0], [1], [0, 0, 1, 1], [], []>} : vector<2x4xf32>, vector<4x64xf32>, vector<2x64xf32> -> vector<2x64xf32>
    %c0_14 = arith.constant 0 : index
    %c0_15 = arith.constant 0 : index
    %19 = vector.load %arg5[%c0_14, %c0_15] : memref<1x64xf32, #tpu.memory_space<vmem>>, vector<1x64xf32>
    %20 = vector.broadcast %19 : vector<1x64xf32> to vector<2x64xf32>
    %21 = arith.addf %18, %20 : vector<2x64xf32>
    %22 = arith.negf %21 : vector<2x64xf32>
    %23 = math.exp %22 : vector<2x64xf32>
    %cst_16 = arith.constant 1.000000e+00 : f32
    %24 = vector.broadcast %cst_16 : f32 to vector<2x64xf32>
    %25 = arith.addf %24, %23 : vector<2x64xf32>
    %26 = arith.divf %24, %25 : vector<2x64xf32>
    %27 = vector.shape_cast %26 : vector<2x64xf32> to vector<2x64x1xf32>
    %28 = vector.broadcast %27 : vector<2x64x1xf32> to vector<2x64x256xf32>
    %29 = arith.mulf %0, %28 : vector<2x64x256xf32>
    %c0_17 = arith.constant 0 : index
    %c0_18 = arith.constant 0 : index
    %c0_19 = arith.constant 0 : index
    %30 = vector.load %arg6[%c0_17, %c0_18, %c0_19] : memref<2x64x256xf32, #tpu.memory_space<vmem>>, vector<2x64x256xf32>
    tpu.vector_store %arg6[%c0_17, %c0_18, %c0_19], %29 {strides = array<i32>} : memref<2x64x256xf32, #tpu.memory_space<vmem>>, vector<2x64x256xf32>,
    return
  }
  func.func @transform_0(%arg0: i32) -> (i32, i32, i32) {
    %c0_i32 = arith.constant 0 : i32
    %c0_i32_0 = arith.constant 0 : i32
    %c0_i32_1 = arith.constant 0 : i32
    return %arg0, %c0_i32, %c0_i32_0 : i32, i32, i32
  }
  func.func @transform_1(%arg0: i32) -> (i32, i32) {
    %c0_i32 = arith.constant 0 : i32
    %c0_i32_0 = arith.constant 0 : i32
    %c0_i32_1 = arith.constant 0 : i32
    return %c0_i32, %c0_i32_0 : i32, i32
  }
  func.func @transform_2(%arg0: i32) -> (i32, i32) {
    %c0_i32 = arith.constant 0 : i32
    %c0_i32_0 = arith.constant 0 : i32
    %c0_i32_1 = arith.constant 0 : i32
    return %c0_i32, %c0_i32_0 : i32, i32
  }
  func.func @transform_3(%arg0: i32) -> (i32, i32) {
    %c0_i32 = arith.constant 0 : i32
    %c0_i32_0 = arith.constant 0 : i32
    %c0_i32_1 = arith.constant 0 : i32
    return %c0_i32, %c0_i32_0 : i32, i32
  }
  func.func @transform_4(%arg0: i32) -> (i32, i32) {
    %c0_i32 = arith.constant 0 : i32
    %c0_i32_0 = arith.constant 0 : i32
    %c0_i32_1 = arith.constant 0 : i32
    return %c0_i32, %c0_i32_0 : i32, i32
  }
  func.func @transform_5(%arg0: i32) -> (i32, i32, i32) {
    %c0_i32 = arith.constant 0 : i32
    %c0_i32_0 = arith.constant 0 : i32
    %c0_i32_1 = arith.constant 0 : i32
    return %arg0, %c0_i32, %c0_i32_0 : i32, i32, i32
  }
}

</mosaic_0001>

<bundles_post_ra>
// kernel: tpu_custom_call.1
= control target key start
LH: loop header
LB: loop body
LE: loop exit
PB: predicated region body
PF: predicated region fallthrough
CT: control target
= control target key end

     0   :  { %10 = vsyncpa [#allocation3], 0  ;;  %s812_s0 = inlined_call_operand.hbm [shape: f32[2,64,256], index: 0, kind: input, shape index: {}]   ;;  %s813_s1 = inlined_call_operand.vmem [shape: f32[64,4], index: 1, kind: input, shape index: {}]   ;;  %s814_s2 = inlined_call_operand.vmem [shape: f32[1,4], index: 2, kind: input, shape index: {}]   ;;  %s815_s3 = inlined_call_operand.vmem [shape: f32[4,64], index: 3, kind: input, shape index: {}]   ;;  %s816_s4 = inlined_call_operand.vmem [shape: f32[1,64], index: 4, kind: input, shape index: {}]   ;;  %s817_s5 = inlined_call_operand.hbm [shape: f32[2,64,256], index: 5, kind: output, shape index: {}]  }
   0x1   :  { %11 = vsyncpa [#allocation4], 0  ;;  %s16_s20 = sshll.u32 %s812_s0, 4  ;;  %s595_s21 = smov [#allocation2]   ;;  %s17_s20 = int_to_ptr.hbm [resolvable:$true] %s16_s20 }
   0x2   :  { %s18_s22 = sshll.u32 %s595_s21, 4  ;;  %s596_s23 = smov 256   ;;  %s19_s22 = int_to_ptr.vmem [resolvable:$true] %s18_s22 }
   0x3   :  { %s597_s24 = smov 16  }
   0x4   :  { %24 = dma.hbm_to_vmem [thread:$0]  %s17_s20, 4096, %s19_s22, [#allocation3], %s596_s23, %s596_s23, %s597_s24  }
   0x5   :  { %591 = dma.done.wait [#allocation3], 4096  }
   0x6   :  { %592 = vsyncadd [#allocation3], 4294963200  ;;  %v635_v0 = vld [vmem:[#allocation2 + $0x80] sm:$0xff]  ;;  %v637_v1 = vld [vmem:[#allocation2 + $0x88] sm:$0xff]  ;;  %vm166_vm0 = vcmask 130112   ;;  %vm170_vm1 = vcmask 195712  }
   0x7   :  { %v639_v2 = vld [vmem:[#allocation2] sm:$0xff]  ;;  %v93_v3 = vadd.f32 %v637_v1, %v635_v0  ;;  %v643_v4 = vld [vmem:[#allocation2 + $0x8] sm:$0xff]  ;;  %v653_v9 = vld [vmem:[#allocation2 + $0x90] sm:$0xff]  ;;  %vm174_vm2 = vcmask 261312   ;;  %vm178_vm3 = vcmask 326912   ;;  %vm182_vm4 = vcmask 392512  }
   0x8   :  { %v645_v5 = vld [vmem:[#allocation2 + $0x20] sm:$0xff]  ;;  %v647_v6 = vld [vmem:[#allocation2 + $0x28] sm:$0xff]  ;;  %v69_v7 = vadd.f32 %v643_v4, %v639_v2  ;;  %v655_v10 = vld [vmem:[#allocation2 + $0x98] sm:$0xff]  ;;  %vm186_vm5 = vcmask 458112   ;;  %vm190_vm6 = vcmask 523712   ;;  %vm207_vm7 = vcmask 1041409  }
   0x9   :  { %v75_v8 = vadd.f32 %v647_v6, %v645_v5  ;;  %94 = vadd.xlane.f32.xlu1 %v93_v3  ;;  %v657_v11 = vld [vmem:[#allocation2 + $0x10] sm:$0xff]  ;;  %v659_v12 = vld [vmem:[#allocation2 + $0x18] sm:$0xff]  ;;  %v661_v13 = vld [vmem:[#allocation2 + $0xa0] sm:$0xff]  ;;  %v96_v15 = vadd.f32 %v655_v10, %v653_v9  ;;  %vm209_vm8 = vcmask 523264   ;;  %vm285_vm9 = vcmask 1043456   ;;  %s496_s21 = sshll.u32 %s817_s5, 4  ;;  %s497_s21 = int_to_ptr.hbm [resolvable:$true] %s496_s21 }
   0xa   :  { %70 = vadd.xlane.f32.xlu0 %v69_v7  ;;  %v663_v14 = vld [vmem:[#allocation2 + $0xa8] sm:$0xff]  ;;  %v72_v16 = vadd.f32 %v659_v12, %v657_v11  ;;  %v671_v18 = vld [vmem:[#allocation2 + $0xb0] sm:$0xff]  ;;  %v673_v19 = vld [vmem:[#allocation2 + $0xb8] sm:$0xff]  ;;  %v818_v7 = vlaneseq  ;;  %vm281_vm14 = vcmask 31744  }
   0xb   :  { %76 = vadd.xlane.f32.xlu2 %v75_v8  ;;  %v99_v17 = vadd.f32 %v663_v14, %v661_v13  ;;  %v675_v20 = vld [vmem:[#allocation2 + $0x30] sm:$0xff]  ;;  %v677_v21 = vld [vmem:[#allocation2 + $0x38] sm:$0xff]  ;;  %v679_v22 = vld [vmem:[#allocation2 + $0x40] sm:$0xff]  ;;  %v102_v24 = vadd.f32 %v673_v19, %v671_v18 }
   0xc   :  { %v681_v23 = vld [vmem:[#allocation2 + $0x48] sm:$0xff]  ;;  %v78_v25 = vadd.f32 %v677_v21, %v675_v20  ;;  %v689_v27 = vld [vmem:[#allocation2 + $0x50] sm:$0xff]  ;;  %v691_v28 = vld [vmem:[#allocation2 + $0x58] sm:$0xff]  ;;  %v162_v8 = vand.u32 127, %v818_v7 }
   0xd   :  { %v81_v26 = vadd.f32 %v681_v23, %v679_v22  ;;  %v693_v29 = vld [vmem:[#allocation2 + $0xc0] sm:$0xff]  ;;  %v695_v30 = vld [vmem:[#allocation2 + $0xc8] sm:$0xff]  ;;  %v697_v31 = vld [vmem:[#allocation2 + $0xd0] sm:$0xff]  ;;  %v84_v33 = vadd.f32 %v691_v28, %v689_v27 }
   0xe   :  { %821 = vst [vmem:[#allocation8_spill] sm:$0xff] %v697_v31  ;;  %v699_v32 = vld [vmem:[#allocation2 + $0xd8] sm:$0xff]  ;;  %v105_v34 = vadd.f32 %v695_v30, %v693_v29  ;;  %v707_v36 = vld [vmem:[#allocation2 + $0xe0] sm:$0xff]  ;;  %v709_v37 = vld [vmem:[#allocation2 + $0xe8] sm:$0xff] }
   0xf   :  { %822 = vst [vmem:[#allocation9_spill] sm:$0xff] %v699_v32  ;;  %v108_v35 = vadd.f32 %v699_v32, %v697_v31  ;;  %v711_v38 = vld [vmem:[#allocation2 + $0x60] sm:$0xff]  ;;  %v713_v39 = vld [vmem:[#allocation2 + $0x68] sm:$0xff]  ;;  %v715_v40 = vld [vmem:[#allocation2 + $0x70] sm:$0xff]  ;;  %v111_v42 = vadd.f32 %v709_v37, %v707_v36 }
  0x10   :  { %v717_v41 = vld [vmem:[#allocation2 + $0x78] sm:$0xff]  ;;  %v87_v43 = vadd.f32 %v713_v39, %v711_v38  ;;  %v725_v45 = vld [vmem:[#allocation2 + $0xf0] sm:$0xff]  ;;  %v138_v53 = vld [vmem:[%s813_s1 + $0x28] sm:$0xff] }
  0x11   :  { %97 = vadd.xlane.f32.xlu1 %v96_v15  ;;  %v90_v44 = vadd.f32 %v717_v41, %v715_v40  ;;  %v727_v46 = vld [vmem:[#allocation2 + $0xf8] sm:$0xff]  ;;  %v139_v52 = vld [vmem:[%s813_s1 + $0x30] sm:$0xff]  ;;  %v137_v54 = vld [vmem:[%s813_s1 + $0x20] sm:$0xff] }
  0x12   :  { %73 = vadd.xlane.f32.xlu0 %v72_v16  ;;  %v114_v47 = vadd.f32 %v727_v46, %v725_v45  ;;  %v140_v48 = vld [vmem:[%s813_s1 + $0x38] sm:$0xff]  ;;  %v135_v59 = vld [vmem:[%s813_s1 + $0x10] sm:$0xff]  ;;  %v134_v60 = vld [vmem:[%s813_s1 + $0x8] sm:$0xff] }
  0x13   :  { %100 = vadd.xlane.f32.xlu2 %v99_v17  ;;  %220 = vmatpush.msra.mxu0 %v140_v48  ;;  %v136_v55 = vld [vmem:[%s813_s1 + $0x18] sm:$0xff]  ;;  %v133_v61 = vld [vmem:[%s813_s1] sm:$0xff] }
  0x15   :  { %221 = vmatpush.msra.mxu0 %v139_v52 }
  0x17   :  { %222 = vmatpush.msra.mxu0 %v138_v53 }
  0x19   :  { %103 = vadd.xlane.f32.xlu1 %v102_v24  ;;  %223 = vmatpush.msra.mxu0 %v137_v54  ;;  %v164_v24 = vadd.s32 4294967288, %v162_v8 }
  0x1a   :  { %79 = vadd.xlane.f32.xlu0 %v78_v25 }
  0x1b   :  { %82 = vadd.xlane.f32.xlu2 %v81_v26  ;;  %224 = vmatpush.msra.mxu0 %v136_v55 }
  0x1d   :  { %225 = vmatpush.msra.mxu0 %v135_v59 }
  0x1f   :  { %226 = vmatpush.msra.mxu0 %v134_v60  ;;  %v176_v60 = vadd.s32 4294967264, %v162_v8 }
  0x21   :  { %85 = vadd.xlane.f32.xlu1 %v84_v33  ;;  %227 = vmatpush.msra.mxu0 %v133_v61 }
  0x22   :  { %106 = vadd.xlane.f32.xlu0 %v105_v34 }
  0x23   :  { %109 = vadd.xlane.f32.xlu2 %v108_v35  ;;  %v168_v35 = vadd.s32 4294967280, %v162_v8 }
  0x29   :  { %112 = vadd.xlane.f32.xlu1 %v111_v42 }
  0x2a   :  { %88 = vadd.xlane.f32.xlu0 %v87_v43 }
  0x2b   :  { %91 = vadd.xlane.f32.xlu2 %v90_v44  ;;  %v172_v44 = vadd.s32 4294967272, %v162_v8 }
  0x32   :  { %115 = vadd.xlane.f32.xlu0 %v114_v47 }
  0x7c   :  { %v95_v49 = vpop.xlane.xlu1 %94 }
  0x7d   :  { %v71_v50 = vpop.xlane.xlu0 %70  ;;  %v125_v26 = vmul.f32 0.00390625, %v95_v49 }
  0x7e   :  { %v77_v51 = vpop.xlane.xlu2 %76  ;;  %v117_v33 = vmul.f32 0.00390625, %v71_v50 }
  0x7f   :  { %v119_v42 = vmul.f32 0.00390625, %v77_v51  ;;  %v192_v52 = vperm.slane %v125_v26, %v162_v8 }
  0x80   :  { %v163_v53 = vperm.slane %v117_v33, %v162_v8 }
  0x81   :  { %v169_v59 = vperm.slane %v119_v42, %v168_v35 }
  0x84   :  { %v98_v56 = vpop.xlane.xlu1 %97 }
  0x85   :  { %v74_v57 = vpop.xlane.xlu0 %73  ;;  %v126_v34 = vmul.f32 0.00390625, %v98_v56  ;;  %v180_v56 = vadd.s32 4294967256, %v162_v8 }
  0x86   :  { %v101_v58 = vpop.xlane.xlu2 %100  ;;  %v118_v25 = vmul.f32 0.00390625, %v74_v57 }
  0x87   :  { %v127_v48 = vmul.f32 0.00390625, %v101_v58  ;;  %v193_v54 = vperm.slane %v126_v34, %v164_v24 }
  0x88   :  { %v165_v43 = vperm.slane %v118_v25, %v164_v24 }
  0x89   :  { %v195_v32 = vperm.slane %v127_v48, %v168_v35  ;;  %v194_v26 = vsel %vm166_vm0, %v193_v54, %v192_v52 }
  0x8a   :  { %v167_v49 = vsel %vm166_vm0, %v165_v43, %v163_v53 }
  0x8b   :  { %v196_v35 = vsel %vm170_vm1, %v195_v32, %v194_v26 }
  0x8c   :  { %v104_v62 = vpop.xlane.xlu1 %103 }
  0x8d   :  { %v80_v63 = vpop.xlane.xlu0 %79  ;;  %v128_v55 = vmul.f32 0.00390625, %v104_v62 }
  0x8e   :  { %v83_v3 = vpop.xlane.xlu2 %82  ;;  %v120_v47 = vmul.f32 0.00390625, %v80_v63  ;;  %v184_v63 = vadd.s32 4294967248, %v162_v8 }
  0x8f   :  { %v121_v61 = vmul.f32 0.00390625, %v83_v3  ;;  %v197_v24 = vperm.slane %v128_v55, %v172_v44  ;;  %v171_v3 = vsel %vm170_vm1, %v169_v59, %v167_v49 }
  0x90   :  { %v173_v50 = vperm.slane %v120_v47, %v172_v44 }
  0x91   :  { %v198_v53 = vsel %vm174_vm2, %v197_v24, %v196_v35 }
  0x92   :  { %v175_v42 = vsel %vm174_vm2, %v173_v50, %v171_v3 }
  0x94   :  { %v86_v15 = vpop.xlane.xlu1 %85 }
  0x95   :  { %v107_v16 = vpop.xlane.xlu0 %106  ;;  %v122_v51 = vmul.f32 0.00390625, %v86_v15  ;;  %v188_v15 = vadd.s32 4294967240, %v162_v8 }
  0x96   :  { %v110_v17 = vpop.xlane.xlu2 %109  ;;  %v129_v7 = vmul.f32 0.00390625, %v107_v16  ;;  %v177_v16 = vperm.slane %v121_v61, %v176_v60 }
  0x97   :  { %v130_v62 = vmul.f32 0.00390625, %v110_v17  ;;  %v181_v43 = vperm.slane %v122_v51, %v180_v56 }
  0x98   :  { %v199_v33 = vperm.slane %v129_v7, %v176_v60  ;;  %v179_v17 = vsel %vm178_vm3, %v177_v16, %v175_v42  ;;  %v276_v42 = vld [vmem:[%s815_s3] sm:$0xf] }
  0x99   :  { %v201_v52 = vperm.slane %v130_v62, %v180_v56  ;;  %v183_v55 = vsel %vm182_vm4, %v181_v43, %v179_v17  ;;  %v535_v56 = vld [vmem:[%s814_s2] ss:$0 sm:$0xff]  ;;  %511 = vmatpush.msk.msra.mxu1 %vm285_vm9, %v276_v42 }
  0x9a   :  { %v200_v44 = vsel %vm178_vm3, %v199_v33, %v198_v53 }
  0x9b   :  { %v202_v8 = vsel %vm182_vm4, %v201_v52, %v200_v44 }
  0x9c   :  { %v113_v25 = vpop.xlane.xlu1 %112 }
  0x9d   :  { %v89_v57 = vpop.xlane.xlu0 %88  ;;  %v131_v34 = vmul.f32 0.00390625, %v113_v25 }
  0x9e   :  { %v123_v31 = vmul.f32 0.00390625, %v89_v57  ;;  %v92_v58 = vpop.xlane.xlu2 %91 }
  0x9f   :  { %v124_v47 = vmul.f32 0.00390625, %v92_v58  ;;  %v203_v54 = vperm.slane %v131_v34, %v184_v63 }
  0xa0   :  { %v185_v48 = vperm.slane %v123_v31, %v184_v63 }
  0xa1   :  { %v189_v59 = vperm.slane %v124_v47, %v188_v15  ;;  %v204_v32 = vsel %vm186_vm5, %v203_v54, %v202_v8 }
  0xa2   :  { %v187_v61 = vsel %vm186_vm5, %v185_v48, %v183_v55 }
  0xa3   :  { %v191_v31 = vsel %vm190_vm6, %v189_v59, %v187_v61 }
  0xa5   :  { %v116_v7 = vpop.xlane.xlu0 %115 }
  0xa6   :  { %v132_v60 = vmul.f32 0.00390625, %v116_v7 }
  0xa8   :  { %v205_v57 = vperm.slane %v132_v60, %v188_v15 }
  0xaa   :  { %v206_v49 = vsel %vm190_vm6, %v205_v57, %v204_v32 }
  0xab   :  { %v208_v50 = vsel %vm207_vm7, %v206_v49, %v191_v31 }
  0xac   :  { %509 = vmatmul.msk.f32.vlgmr.msra.gmra.mxu0 %vm209_vm8, %v208_v50 }
 0x129   :  { %v229_v51 = vpop.f32.mrf.mxu0 }
 0x12a   :  { %v230_v25 = vadd.f32 %v535_v56, %v229_v51 }
 0x12c   :  { %v233_v63 = vmul.f32 0.70710677, %v230_v25 }
 0x12e   :  { %v234_v58 = vmul.f32 %v233_v63, %v233_v63 }
 0x130   :  { %v235_v26 = vmin.f32 %v234_v58, 16.0 }
 0x132   :  { %v236_v24 = vmul.f32 2.1237322e-06, %v235_v26  ;;  %v247_v62 = vmul.f32 3.8918573e-05, %v235_v26 }
 0x134   :  { %v237_v3 = vadd.f32 0.00028619796, %v236_v24  ;;  %v248_v16 = vadd.f32 0.001143296, %v247_v62 }
 0x136   :  { %v238_v33 = vmul.f32 %v237_v3, %v235_v26  ;;  %v249_v34 = vmul.f32 %v248_v16, %v235_v26  ;;  %v232_v16 = vmul.f32 0.5, %v230_v25 }
 0x138   :  { %v250_v43 = vadd.f32 0.014752088, %v249_v34  ;;  %v239_v15 = vadd.f32 0.0036580483, %v238_v33  ;;  %v823_v34 = vlaneseq }
 0x13a   :  { %v251_v47 = vmul.f32 %v250_v43, %v235_v26  ;;  %v240_v48 = vmul.f32 %v239_v15, %v235_v26  ;;  %v330_v42 = vshrl.u32 %v823_v34, 7 }
 0x13c   :  { %v252_v35 = vadd.f32 0.112945676, %v251_v47  ;;  %v241_v17 = vadd.f32 0.05243302, %v240_v48  ;;  %518 = vset.pattern.permute.xlu1 %v330_v42  ;;  %v343_v43 = vadd.s32 16, %v330_v42  ;;  %v337_v15 = vadd.s32 8, %v330_v42 }
 0x13e   :  { %v253_v53 = vmul.f32 %v252_v35, %v235_v26  ;;  %v242_v7 = vmul.f32 %v241_v17, %v235_v26  ;;  %520 = vset.pattern.permute.xlu0 %v343_v43  ;;  %519 = vset.pattern.permute.xlu2 %v337_v15 }
 0x140   :  { %v254_v52 = vadd.f32 0.4994258, %v253_v53  ;;  %v243_v55 = vadd.f32 0.18741608, %v242_v7 }
 0x142   :  { %v255_v44 = vmul.f32 %v254_v52, %v235_v26  ;;  %v244_v60 = vmul.f32 %v243_v55, %v235_v26 }
 0x144   :  { %v256_v54 = vadd.f32 1.0, %v255_v44  ;;  %v245_v32 = vadd.f32 1.1283791, %v244_v60 }
 0x146   :  { %537 = vrcp.f32 %v256_v54  ;;  %v268_v57 = vand.u32 2147483648, %v256_v54  ;;  %v266_v49 = vand.u32 2147483647, %v256_v54  ;;  %vm262_vm11 = vweird.f32 %v256_v54 }
 0x147   :  { %v246_v51 = vmul.f32 %v245_v32, %v233_v63  ;;  %v536_v63 = vld [vmem:[%s816_s4] ss:$0 sm:$0xff]  ;;  %v349_v32 = vadd.s32 24, %v330_v42  ;;  %s598_s4 = smov [#allocation5]  }
 0x148   :  { %v269_v56 = vor.u32 1.1754944e-38, %v268_v57  ;;  %vm267_vm13 = vcmp.eq.f32.partialorder %v266_v49, 8.507059e+37  ;;  %s494_s18 = sshll.u32 %s598_s4, 4  ;;  %s495_s18 = int_to_ptr.vmem [resolvable:$true] %s494_s18 }
 0x14c   :  { %v538_v59 = vpop.eup %537 }
 0x14d   :  { %v258_v61 = vmul.f32 %v538_v59, %v256_v54  ;;  %vm263_vm10 = vweird.f32 %v538_v59 }
 0x14e   :  { %vm264_vm12 = vmor %vm262_vm11, %vm263_vm10 }
 0x14f   :  { %v259_v8 = vsub.f32 1.0, %v258_v61 }
 0x151   :  { %v260_v31 = vmul.f32 %v538_v59, %v259_v8 }
 0x153   :  { %v261_v50 = vadd.f32 %v538_v59, %v260_v31  ;;  %v355_v31 = vadd.s32 32, %v330_v42 }
 0x155   :  { %v265_v58 = vsel %vm264_vm12, %v538_v59, %v261_v50  ;;  %v367_v50 = vadd.s32 48, %v330_v42 }
 0x156   :  { %v270_v24 = vsel %vm267_vm13, %v269_v56, %v265_v58  ;;  %v361_v56 = vadd.s32 40, %v330_v42 }
 0x157   :  { %v271_v62 = vmul.f32 %v270_v24, %v246_v51  ;;  %v373_v51 = vadd.s32 56, %v330_v42 }
 0x159   :  { %v510_v3 = vclamps-f32 %v271_v62, 1.0 }
 0x15b   :  { %v274_v33 = vadd.f32 1.0, %v510_v3 }
 0x15d   :  { %v275_v26 = vmul.f32 %v274_v33, %v232_v16 }
 0x15f   :  { %512 = vmatmul.msk.f32.vlgmr.msra.gmra.mxu1 %vm281_vm14, %v275_v26 }
 0x1dc   :  { %v306_v47 = vpop.f32.mrf.mxu1 }
 0x1dd   :  { %v307_v35 = vadd.f32 %v536_v63, %v306_v47 }
 0x1df   :  { %v513_v48 = vmul.f32 -1.442695, %v307_v35 }
 0x1e1   :  { %539 = vpow2.f32 %v513_v48 }
 0x1e7   :  { %v540_v25 = vpop.eup %539 }
 0x1e8   :  { %v312_v53 = vadd.f32 1.0, %v540_v25 }
 0x1ea   :  { %541 = vrcp.f32 %v312_v53  ;;  %v324_v54 = vand.u32 2147483648, %v312_v53  ;;  %v322_v55 = vand.u32 2147483647, %v312_v53  ;;  %vm318_vm0 = vweird.f32 %v312_v53 }
 0x1ec   :  { %v325_v60 = vor.u32 1.1754944e-38, %v324_v54  ;;  %vm323_vm2 = vcmp.eq.f32.partialorder %v322_v55, 8.507059e+37 }
 0x1f0   :  { %v542_v52 = vpop.eup %541 }
 0x1f1   :  { %v314_v17 = vmul.f32 %v542_v52, %v312_v53  ;;  %vm319_vm15 = vweird.f32 %v542_v52 }
 0x1f2   :  { %vm320_vm1 = vmor %vm318_vm0, %vm319_vm15 }
 0x1f3   :  { %v315_v44 = vsub.f32 1.0, %v314_v17 }
 0x1f5   :  { %v316_v7 = vmul.f32 %v542_v52, %v315_v44 }
 0x1f7   :  { %v317_v59 = vadd.f32 %v542_v52, %v316_v7  ;;  %v825_v7 = vld [vmem:[#allocation9_spill] sm:$0xff] }
 0x1f9   :  { %v321_v61 = vsel %vm320_vm1, %v542_v52, %v317_v59 }
 0x1fa   :  { %v326_v8 = vsel %vm323_vm2, %v325_v60, %v321_v61 }
 0x1fb   :  { %v328_v57 = vperm.slane %v326_v8, 0  ;;  %v377_v49 = vperm.slane %v326_v8, 1 }
 0x1fd   :  { %345 = vperm.xlu0 %520, %v328_v57   ;;  %339 = vperm.xlu2 %519, %v328_v57  }
 0x1fe   :  { %333 = vperm.xlu1 %518, %v328_v57  }
 0x205   :  { %527 = vset.pattern.permute.xlu0 %v337_v15  ;;  %521 = vset.pattern.permute.xlu2 %v349_v32 }
 0x206   :  { %522 = vset.pattern.permute.xlu1 %v355_v31 }
 0x20d   :  { %388 = vperm.xlu0 %527, %v377_v49   ;;  %351 = vperm.xlu2 %521, %v328_v57  }
 0x20e   :  { %357 = vperm.xlu1 %522, %v328_v57  }
 0x215   :  { %532 = vset.pattern.permute.xlu0 %v367_v50  ;;  %523 = vset.pattern.permute.xlu2 %v361_v56 }
 0x216   :  { %524 = vset.pattern.permute.xlu1 %v367_v50 }
 0x21d   :  { %418 = vperm.xlu0 %532, %v377_v49   ;;  %363 = vperm.xlu2 %523, %v328_v57  }
 0x21e   :  { %369 = vperm.xlu1 %524, %v328_v57  }
 0x225   :  { %525 = vset.pattern.permute.xlu2 %v373_v51  ;;  %534 = vset.pattern.permute.xlu0 %v373_v51 }
 0x226   :  { %526 = vset.pattern.permute.xlu1 %v330_v42 }
 0x22d   :  { %375 = vperm.xlu2 %525, %v328_v57  }
 0x22e   :  { %382 = vperm.xlu1 %526, %v377_v49  }
 0x235   :  { %528 = vset.pattern.permute.xlu2 %v343_v43 }
 0x236   :  { %529 = vset.pattern.permute.xlu1 %v349_v32 }
 0x23d   :  { %394 = vperm.xlu2 %528, %v377_v49  }
 0x23e   :  { %400 = vperm.xlu1 %529, %v377_v49  }
 0x245   :  { %530 = vset.pattern.permute.xlu2 %v355_v31 }
 0x246   :  { %531 = vset.pattern.permute.xlu1 %v361_v56 }
 0x24d   :  { %406 = vperm.xlu2 %530, %v377_v49  }
 0x24e   :  { %412 = vperm.xlu1 %531, %v377_v49  }
 0x255   :  { %533 = vset.pattern.permute.xlu2 %v373_v51 }
 0x257   :  { %v340_v58 = vpop.permute.xlu2 %339 }
 0x258   :  { %v428_v24 = vmul.f32 %v340_v58, %v657_v11  ;;  %v429_v62 = vmul.f32 %v340_v58, %v659_v12 }
 0x25a   :  { %460 = vst [vmem:[#allocation5 + $0x10] sm:$0xff] %v428_v24 }
 0x25b   :  { %461 = vst [vmem:[#allocation5 + $0x18] sm:$0xff] %v429_v62 }
 0x25d   :  { %424 = vperm.xlu2 %533, %v377_v49  }
 0x267   :  { %v352_v3 = vpop.permute.xlu2 %351 }
 0x268   :  { %v432_v16 = vmul.f32 %v352_v3, %v675_v20  ;;  %v433_v33 = vmul.f32 %v352_v3, %v677_v21 }
 0x26a   :  { %464 = vst [vmem:[#allocation5 + $0x30] sm:$0xff] %v432_v16 }
 0x26b   :  { %465 = vst [vmem:[#allocation5 + $0x38] sm:$0xff] %v433_v33 }
 0x26f   :  { %v346_v26 = vpop.permute.xlu0 %345 }
 0x270   :  { %v430_v34 = vmul.f32 %v346_v26, %v645_v5  ;;  %v431_v42 = vmul.f32 %v346_v26, %v647_v6  ;;  %v334_v43 = vpop.permute.xlu1 %333 }
 0x271   :  { %v426_v11 = vmul.f32 %v334_v43, %v639_v2  ;;  %v427_v12 = vmul.f32 %v334_v43, %v643_v4 }
 0x272   :  { %462 = vst [vmem:[#allocation5 + $0x20] sm:$0xff] %v430_v34 }
 0x273   :  { %463 = vst [vmem:[#allocation5 + $0x28] sm:$0xff] %v431_v42 }
 0x274   :  { %458 = vst [vmem:[#allocation5] sm:$0xff] %v426_v11 }
 0x275   :  { %459 = vst [vmem:[#allocation5 + $0x8] sm:$0xff] %v427_v12 }
 0x277   :  { %v364_v15 = vpop.permute.xlu2 %363 }
 0x278   :  { %v436_v20 = vmul.f32 %v364_v15, %v689_v27  ;;  %v437_v21 = vmul.f32 %v364_v15, %v691_v28 }
 0x27a   :  { %468 = vst [vmem:[#allocation5 + $0x50] sm:$0xff] %v436_v20 }
 0x27b   :  { %469 = vst [vmem:[#allocation5 + $0x58] sm:$0xff] %v437_v21 }
 0x27f   :  { %v389_v63 = vpop.permute.xlu0 %388 }
 0x280   :  { %v444_v5 = vmul.f32 %v389_v63, %v653_v9  ;;  %v445_v6 = vmul.f32 %v389_v63, %v655_v10  ;;  %v358_v47 = vpop.permute.xlu1 %357 }
 0x281   :  { %v434_v2 = vmul.f32 %v358_v47, %v679_v22  ;;  %v435_v4 = vmul.f32 %v358_v47, %v681_v23 }
 0x282   :  { %476 = vst [vmem:[#allocation5 + $0x90] sm:$0xff] %v444_v5 }
 0x283   :  { %477 = vst [vmem:[#allocation5 + $0x98] sm:$0xff] %v445_v6 }
 0x284   :  { %466 = vst [vmem:[#allocation5 + $0x40] sm:$0xff] %v434_v2 }
 0x285   :  { %467 = vst [vmem:[#allocation5 + $0x48] sm:$0xff] %v435_v4 }
 0x287   :  { %v376_v35 = vpop.permute.xlu2 %375 }
 0x288   :  { %v440_v27 = vmul.f32 %v376_v35, %v715_v40  ;;  %v441_v28 = vmul.f32 %v376_v35, %v717_v41 }
 0x28a   :  { %472 = vst [vmem:[#allocation5 + $0x70] sm:$0xff] %v440_v27 }
 0x28b   :  { %473 = vst [vmem:[#allocation5 + $0x78] sm:$0xff] %v441_v28 }
 0x28f   :  { %v419_v48 = vpop.permute.xlu0 %418 }
 0x290   :  { %v454_v9 = vmul.f32 %v419_v48, %v707_v36  ;;  %v455_v10 = vmul.f32 %v419_v48, %v709_v37  ;;  %v370_v25 = vpop.permute.xlu1 %369 }
 0x291   :  { %v438_v22 = vmul.f32 %v370_v25, %v711_v38  ;;  %v439_v23 = vmul.f32 %v370_v25, %v713_v39 }
 0x292   :  { %486 = vst [vmem:[#allocation5 + $0xe0] sm:$0xff] %v454_v9 }
 0x293   :  { %487 = vst [vmem:[#allocation5 + $0xe8] sm:$0xff] %v455_v10 }
 0x294   :  { %470 = vst [vmem:[#allocation5 + $0x60] sm:$0xff] %v438_v22 }
 0x295   :  { %471 = vst [vmem:[#allocation5 + $0x68] sm:$0xff] %v439_v23 }
 0x297   :  { %v395_v53 = vpop.permute.xlu2 %394 }
 0x298   :  { %v446_v40 = vmul.f32 %v395_v53, %v661_v13  ;;  %v447_v41 = vmul.f32 %v395_v53, %v663_v14 }
 0x29a   :  { %478 = vst [vmem:[#allocation5 + $0xa0] sm:$0xff] %v446_v40 }
 0x29b   :  { %479 = vst [vmem:[#allocation5 + $0xa8] sm:$0xff] %v447_v41 }
 0x2a0   :  { %v383_v52 = vpop.permute.xlu1 %382 }
 0x2a1   :  { %v442_v36 = vmul.f32 %v383_v52, %v635_v0  ;;  %v443_v37 = vmul.f32 %v383_v52, %v637_v1 }
 0x2a3   :  { %474 = vst [vmem:[#allocation5 + $0x80] sm:$0xff] %v442_v36 }
 0x2a4   :  { %475 = vst [vmem:[#allocation5 + $0x88] sm:$0xff] %v443_v37 }
 0x2a7   :  { %v407_v38 = vpop.permute.xlu2 %406 }
 0x2a8   :  { %v450_v39 = vmul.f32 %v407_v38, %v693_v29  ;;  %v451_v17 = vmul.f32 %v407_v38, %v695_v30  ;;  %v824_v30 = vld [vmem:[#allocation8_spill] sm:$0xff] }
 0x2aa   :  { %482 = vst [vmem:[#allocation5 + $0xc0] sm:$0xff] %v450_v39 }
 0x2ab   :  { %483 = vst [vmem:[#allocation5 + $0xc8] sm:$0xff] %v451_v17 }
 0x2b0   :  { %v401_v44 = vpop.permute.xlu1 %400 }
 0x2b1   :  { %v448_v13 = vmul.f32 %v401_v44, %v671_v18  ;;  %v449_v14 = vmul.f32 %v401_v44, %v673_v19 }
 0x2b3   :  { %480 = vst [vmem:[#allocation5 + $0xb0] sm:$0xff] %v448_v13 }
 0x2b4   :  { %481 = vst [vmem:[#allocation5 + $0xb8] sm:$0xff] %v449_v14 }
 0x2b7   :  { %v425_v54 = vpop.permute.xlu2 %424 }
 0x2b8   :  { %v456_v0 = vmul.f32 %v425_v54, %v725_v45  ;;  %v457_v1 = vmul.f32 %v425_v54, %v727_v46 }
 0x2ba   :  { %488 = vst [vmem:[#allocation5 + $0xf0] sm:$0xff] %v456_v0 }
 0x2bb   :  { %489 = vst [vmem:[#allocation5 + $0xf8] sm:$0xff] %v457_v1 }
 0x2c0   :  { %v413_v29 = vpop.permute.xlu1 %412 }
 0x2c1   :  { %v452_v18 = vmul.f32 %v413_v29, %v824_v30  ;;  %v453_v19 = vmul.f32 %v413_v29, %v825_v7 }
 0x2c3   :  { %484 = vst [vmem:[#allocation5 + $0xd0] sm:$0xff] %v452_v18 }
 0x2c4   :  { %485 = vst [vmem:[#allocation5 + $0xd8] sm:$0xff] %v453_v19 }
 0x2c5   :  { %502 = dma.vmem_to_hbm [thread:$0]  %s495_s18, 4096, %s497_s21, [#allocation4], %s596_s23, %s596_s23, %s597_s24  }
 0x2c6   :  { %593 = dma.done.wait [#allocation4], 4096  }
 0x2c7   :  { %594 = vsyncadd [#allocation4], 4294963200 }
 0x2c8   :  { %507 = vsyncpa [#allocation3], 1 }
 0x2c9   :  { %508 = vsyncpa [#allocation4], 1 }

</bundles_post_ra>
